<compile_context>
chip_gen: v7x
topology: tpu7x:2x2x1
jax: 0.10.0
libtpu: 0.0.40
codegen_flags: <defaults>
</compile_context>

<pallas_src>
import functools as ft

import jax
import jax.numpy as jnp
from jax.experimental import pallas as pl
from jax.experimental.pallas import tpu as pltpu


# ----------------------------------------------------------------------------
# Fused 2-layer LSTM (PyTorch nn.LSTM gate order i, f, g, o), zero initial state
# ----------------------------------------------------------------------------
def lstm2_kernel(x_ref, wih0_ref, whh0_ref, b0_ref, wih1_ref, whh1_ref, b1_ref,
                 out_ref, hn_ref, cn_ref):
    T, B, _ = x_ref.shape
    H = hn_ref.shape[-1]

    wih0 = wih0_ref[...]
    whh0 = whh0_ref[...]
    b0 = b0_ref[...]
    wih1 = wih1_ref[...]
    whh1 = whh1_ref[...]
    b1 = b1_ref[...]

    def cell(x_t, h, c, wih, whh, b):
        g = (jnp.dot(x_t, wih, preferred_element_type=jnp.float32)
             + jnp.dot(h, whh, preferred_element_type=jnp.float32) + b)
        i_g = jax.nn.sigmoid(g[:, 0:H])
        f_g = jax.nn.sigmoid(g[:, H:2 * H])
        g_g = jnp.tanh(g[:, 2 * H:3 * H])
        o_g = jax.nn.sigmoid(g[:, 3 * H:4 * H])
        c_new = f_g * c + i_g * g_g
        h_new = o_g * jnp.tanh(c_new)
        return h_new, c_new

    h0 = jnp.zeros((B, H), jnp.float32)
    c0 = jnp.zeros((B, H), jnp.float32)
    h1 = jnp.zeros((B, H), jnp.float32)
    c1 = jnp.zeros((B, H), jnp.float32)
    for t in range(T):                    # T is small & static -> fully unrolled
        h0, c0 = cell(x_ref[t], h0, c0, wih0, whh0, b0)
        h1, c1 = cell(h0, h1, c1, wih1, whh1, b1)
        out_ref[t] = h1
    hn_ref[0] = h0
    hn_ref[1] = h1
    cn_ref[0] = c0
    cn_ref[1] = c1


def lstm2(x, p):
    """x: (T, B, I).  Returns (out (T,B,H), h_n (2,B,H), c_n (2,B,H))."""
    T, B, _ = x.shape
    H = p["w_hh_l0"].shape[1]
    out, h_n, c_n = pl.pallas_call(
        lstm2_kernel,
        out_shape=[jax.ShapeDtypeStruct((T, B, H), jnp.float32),
                   jax.ShapeDtypeStruct((2, B, H), jnp.float32),
                   jax.ShapeDtypeStruct((2, B, H), jnp.float32)],
    )(x, p["w_ih_l0"].T, p["w_hh_l0"].T, p["b_l0"].reshape(1, 4 * H),
      p["w_ih_l1"].T, p["w_hh_l1"].T, p["b_l1"].reshape(1, 4 * H))
    return out, h_n, c_n


# ----------------------------------------------------------------------------
# Fused heads: decode1 (Linear+ReLU) and mode_top (Linear-ReLU-Dropout-Linear-ReLU-Linear)
# ----------------------------------------------------------------------------
def heads_kernel(x_ref, d1w_ref, d1b_ref, m1w_ref, m1b_ref, m2w_ref, m2b_ref,
                 m3w_ref, m3b_ref, d1_ref, mode_ref):
    x = x_ref[...]
    d1 = jnp.dot(x, d1w_ref[...], preferred_element_type=jnp.float32) + d1b_ref[...]
    d1_ref[...] = jnp.maximum(d1, 0.0)

    m = jnp.dot(x, m1w_ref[...], preferred_element_type=jnp.float32) + m1b_ref[...]
    m = jnp.maximum(m, 0.0)
    # TODO(synk): nn.Dropout(p=0.5) is stochastic in PyTorch train mode; eval-mode identity here.
    m = jnp.dot(m, m2w_ref[...], preferred_element_type=jnp.float32) + m2b_ref[...]
    m = jnp.maximum(m, 0.0)
    mode_ref[...] = (jnp.dot(m, m3w_ref[...], preferred_element_type=jnp.float32)
                     + m3b_ref[...])


def heads(lstm_out, p):
    N = lstm_out.shape[0]
    d1_dim = p["d1_w"].shape[0]
    d1, mode = pl.pallas_call(
        heads_kernel,
        out_shape=[jax.ShapeDtypeStruct((N, d1_dim), jnp.float32),
                   jax.ShapeDtypeStruct((N, p["m3_w"].shape[0]), jnp.float32)],
    )(lstm_out, p["d1_w"].T, p["d1_b"].reshape(1, -1),
      p["m1_w"].T, p["m1_b"].reshape(1, -1),
      p["m2_w"].T, p["m2_b"].reshape(1, -1),
      p["m3_w"].T, p["m3_b"].reshape(1, -1))
    return d1, mode


# ----------------------------------------------------------------------------
# Fused UpsamplingNearest2d(2) + ReplicationPad2d(1) + 3x3 conv + bias + BN(eval)
# + LeakyReLU(0.2), via a parity (space-to-depth) decomposition of the output:
#
#   out[co, n, 2h+ry, 2w+rx] = sum_{sv,sh in {-1,0,+1}} sum_{ci}
#       Weff[(ry,rx), sv, sh, co, ci] * in[ci, n, clamp(h+sv), clamp(w+sh)]
#
# so the kernel only ever touches the small pre-upsample activation.  The 9
# replicate-clamped shifted images are built in VMEM with pltpu.roll + lane-iota
# masks (activation layout (C, N*H*W) keeps the lane axis dense).
# ----------------------------------------------------------------------------
def upconv_kernel(x_ref, w_ref, b_ref, sc_ref, sh_ref, o_ref,
                  *, hin, win, leaky, amt_l, amt_r, amt_u, amt_d):
    x = x_ref[...]
    cin, pt = x.shape
    pos = jax.lax.broadcasted_iota(jnp.int32, (cin, pt), 1)
    wp = pos % win
    hp = (pos // win) % hin
    at_l = wp == 0
    at_r = wp == win - 1
    at_t = hp == 0
    at_b = hp == hin - 1

    # horizontally shifted (replicate-clamped) images: values at (h, w-1) / (h, w) / (h, w+1)
    x_l = jnp.where(at_l, x, pltpu.roll(x, shift=amt_l, axis=1))
    x_r = jnp.where(at_r, x, pltpu.roll(x, shift=amt_r, axis=1))
    horiz = (x_l, x, x_r)

    acc = jnp.zeros((o_ref.shape[0], pt), jnp.float32)
    for si in range(3):                 # vertical shift index: 0 -> h-1, 1 -> h, 2 -> h+1
        for sj in range(3):             # horizontal shift index: 0 -> w-1, 1 -> w, 2 -> w+1
            base = horiz[sj]
            if si == 0:
                img = jnp.where(at_t, base, pltpu.roll(base, shift=amt_u, axis=1))
            elif si == 2:
                img = jnp.where(at_b, base, pltpu.roll(base, shift=amt_d, axis=1))
            else:
                img = base
            acc = acc + jnp.dot(w_ref[si * 3 + sj], img,
                                preferred_element_type=jnp.float32)
    acc = acc + b_ref[...]                     # conv bias (per output channel)
    acc = acc * sc_ref[...] + sh_ref[...]      # folded eval-mode BatchNorm
    if leaky:
        acc = jnp.where(acc >= 0.0, acc, 0.2 * acc)
    o_ref[...] = acc


def _parity_weights(w):
    """w: (Cout, Cin, 3, 3) -> (9, 4*Cout, Cin) parity-GEMM weights.

    Shift index k = si*3 + sj with si/sj in {0: -1, 1: 0, 2: +1} (vertical/horizontal).
    Second-axis row index = (ry*2 + rx)*Cout + co (output-pixel parity planes).
    """
    A = jnp.array(
        [[[1., 0., 0.],      # parity 0: tap d=0 -> shift -1; d=1,2 -> shift 0
          [0., 1., 1.],
          [0., 0., 0.]],
         [[0., 0., 0.],      # parity 1: tap d=0,1 -> shift 0; d=2 -> shift +1
          [1., 1., 0.],
          [0., 0., 1.]]], dtype=jnp.float32)
    co, ci = w.shape[0], w.shape[1]
    weff = jnp.einsum('aeu,ocuv,bfv->abefoc', A, w.astype(jnp.float32), A)
    return weff.transpose(2, 3, 0, 1, 4, 5).reshape(9, 4 * co, ci)


def upconv_layer(x, w, b, bn_scale, bn_shift, n, hin, win, *, leaky, roll_is_np):
    """x: (Cin, P) with P = n*hin*win, raster order (image, row, col).
    Returns the assembled output (Cout, n*(2*hin)*(2*win)) in the same layout."""
    cin, P = x.shape
    cout = w.shape[0]
    img = hin * win
    assert P == n * img

    wk = _parity_weights(w)                              # (9, 4*Cout, Cin)
    b4 = jnp.tile(b, 4).reshape(4 * cout, 1)
    sc4 = jnp.tile(bn_scale, 4).reshape(4 * cout, 1)
    sh4 = jnp.tile(bn_shift, 4).reshape(4 * cout, 1)

    # Tile over whole images; keep the lane dim of each block a multiple of 128.
    # 2 "parallel" steps so both v7x TensorCores get work (and DMA overlaps compute).
    nt = 2
    while nt > 1 and (n % nt != 0 or ((n // nt) * img) % 128 != 0):
        nt -= 1
    pt = (n // nt) * img

    if roll_is_np:   # pltpu.roll(x, s)[p] == x[p - s]  (numpy convention)
        amt_l, amt_r, amt_u, amt_d = 1, pt - 1, win, pt - win
    else:            # flipped convention: pltpu.roll(x, s)[p] == x[p + s]
        amt_l, amt_r, amt_u, amt_d = pt - 1, 1, pt - win, win

    kern = ft.partial(upconv_kernel, hin=hin, win=win, leaky=leaky,
                      amt_l=amt_l, amt_r=amt_r, amt_u=amt_u, amt_d=amt_d)
    planes = pl.pallas_call(
        kern,
        grid=(nt,),
        in_specs=[
            pl.BlockSpec((cin, pt), lambda i: (0, i)),
            pl.BlockSpec((9, 4 * cout, cin), lambda i: (0, 0, 0)),
            pl.BlockSpec((4 * cout, 1), lambda i: (0, 0)),
            pl.BlockSpec((4 * cout, 1), lambda i: (0, 0)),
            pl.BlockSpec((4 * cout, 1), lambda i: (0, 0)),
        ],
        out_specs=pl.BlockSpec((4 * cout, pt), lambda i: (0, i)),
        out_shape=jax.ShapeDtypeStruct((4 * cout, P), jnp.float32),
        compiler_params=pltpu.CompilerParams(
            dimension_semantics=("parallel",),
            vmem_limit_bytes=32 * 1024 * 1024),
    )(x, wk, b4, sc4, sh4)

    # Parity interleave (1x-sized data movement once per layer, stays channels-major):
    # planes[(ry*2+rx)*Cout+co, n*hin*win + h*win + w]
    #   -> out[co, n*(2hin)*(2win) + (2h+ry)*(2win) + (2w+rx)]
    pp = planes.reshape(2, 2, cout, n, hin, win)
    full = pp.transpose(2, 3, 4, 0, 5, 1).reshape(cout, n * (2 * hin) * (2 * win))
    return full


# ----------------------------------------------------------------------------
# Parameters (deterministic synthetic init; module shapes with ngf=2, nc=future_length=1)
# ----------------------------------------------------------------------------
def init_params(key, input_size, hidden):
    ks = jax.random.split(key, 16)
    ngf = 2

    def w(k, shape, scale=0.1):
        return (scale * jax.random.normal(k, shape)).astype(jnp.float32)

    H = hidden
    p = {}
    # 2-layer LSTM (PyTorch layout: w_ih (4H, in), w_hh (4H, H); b = b_ih + b_hh folded)
    p["w_ih_l0"] = w(ks[0], (4 * H, input_size))
    p["w_hh_l0"] = w(ks[1], (4 * H, H))
    p["b_l0"] = jnp.zeros((4 * H,), jnp.float32)
    p["w_ih_l1"] = w(ks[2], (4 * H, H))
    p["w_hh_l1"] = w(ks[3], (4 * H, H))
    p["b_l1"] = jnp.zeros((4 * H,), jnp.float32)
    # decode1: Linear(hidden, ngf*8*2*4*4 = 512) + ReLU
    p["d1_w"] = w(ks[4], (ngf * 8 * 2 * 4 * 4, H))
    p["d1_b"] = jnp.zeros((ngf * 8 * 2 * 4 * 4,), jnp.float32)
    # decode2 convs d2..d6; BatchNorm (eval) folded to per-channel scale/shift
    chans = [(ngf * 8 * 2, ngf * 8), (ngf * 8, ngf * 4),
             (ngf * 4, ngf * 2), (ngf * 2, ngf), (ngf, 1)]
    eps = 1e-3
    for idx, (cin, cout) in enumerate(chans):
        name = f"d{idx + 2}"
        p[name + "_w"] = w(ks[5 + idx], (cout, cin, 3, 3))
        p[name + "_b"] = jnp.zeros((cout,), jnp.float32)
        if idx < 4:   # bn6..bn9: gamma=1, beta=0, running_mean=0, running_var=1
            p[name + "_scale"] = jnp.full((cout,), 1.0 / jnp.sqrt(1.0 + eps), jnp.float32)
            p[name + "_shift"] = jnp.zeros((cout,), jnp.float32)
        else:         # d6 has no BatchNorm
            p[name + "_scale"] = jnp.ones((cout,), jnp.float32)
            p[name + "_shift"] = jnp.zeros((cout,), jnp.float32)
    # mode_top: Linear(H,1024)-ReLU-Dropout-Linear(1024,1024)-ReLU-Linear(1024,3)
    p["m1_w"] = w(ks[10], (1024, H))
    p["m1_b"] = jnp.zeros((1024,), jnp.float32)
    p["m2_w"] = w(ks[11], (1024, 1024), scale=0.03)
    p["m2_b"] = jnp.zeros((1024,), jnp.float32)
    p["m3_w"] = w(ks[12], (3, 1024), scale=0.03)
    p["m3_b"] = jnp.zeros((3,), jnp.float32)
    return p


# ----------------------------------------------------------------------------
# Full forward (== NaiveMapperHeatmap.forward with hidden=None -> zero state)
# ----------------------------------------------------------------------------
def forward(params, x, *, roll_is_np=True):
    """x: (T, B, input_size) — seq-first like nn.LSTM (batch_first=False)."""
    T, B, _ = x.shape
    N = T * B
    H = params["w_hh_l0"].shape[1]

    out1, h_n, c_n = lstm2(x, params)
    lstm_out = out1.reshape(N, H)

    d1, mode = heads(lstm_out, params)                  # decode1 (+ReLU), mode_top MLP

    # decode1 output viewed as NCHW (N, 32, 4, 4) -> channels-major (32, N*4*4)
    c0 = params["d2_w"].shape[1]                        # = ngf*8*2 = 32
    y = d1.reshape(N, c0, 16).transpose(1, 0, 2).reshape(c0, N * 16)

    hin = win = 4
    for name in ("d2", "d3", "d4", "d5", "d6"):
        y = upconv_layer(y, params[name + "_w"], params[name + "_b"],
                         params[name + "_scale"], params[name + "_shift"],
                         N, hin, win, leaky=(name != "d6"), roll_is_np=roll_is_np)
        hin, win = 2 * hin, 2 * win

    pos = y.reshape(N, 1, hin, win)                     # (T*B, 1, 128, 128) NCHW
    return pos, mode, (h_n, c_n)


# ----------------------------------------------------------------------------
# One-off probe: detect pltpu.roll's direction convention (keeps the fused conv
# correct regardless of the lowering's rotate sign).
# ----------------------------------------------------------------------------
def _roll_probe():
    def kern(x_ref, o_ref):
        o_ref[...] = pltpu.roll(x_ref[...], shift=1, axis=1)
    x = jax.lax.broadcasted_iota(jnp.float32, (8, 128), 1)
    out = pl.pallas_call(
        kern, out_shape=jax.ShapeDtypeStruct((8, 128), jnp.float32))(x)
    return bool(out[0, 1] == 0.0)     # numpy convention: out[p] == x[p - 1]


if __name__ == "__main__":
    T, B = 8, 2                  # seq_len, batch
    INPUT_SIZE, HIDDEN = 32, 32  # small shapes for the test
    key = jax.random.PRNGKey(0)
    kp, kx = jax.random.split(key)
    params = init_params(kp, INPUT_SIZE, HIDDEN)
    x = jax.random.normal(kx, (T, B, INPUT_SIZE), dtype=jnp.float32)

    roll_np = _roll_probe()
    fwd = jax.jit(ft.partial(forward, roll_is_np=roll_np))
    pos, mode, (h_n, c_n) = fwd(params, x)
    jax.block_until_ready((pos, mode, h_n, c_n))

    assert pos.shape == (T * B, 1, 128, 128), pos.shape
    assert mode.shape == (T * B, 3), mode.shape
    assert h_n.shape == (2, B, HIDDEN) and c_n.shape == (2, B, HIDDEN)
    assert jnp.all(jnp.isfinite(pos)) and jnp.all(jnp.isfinite(mode))
    print("KERNEL_OK")
</pallas_src>

<mosaic_0001>
module attributes {stable_mosaic.version = 11 : i64} {
  func.func @kern(%arg0: memref<8x128xf32, #tpu.memory_space<vmem>>, %arg1: memref<8x128xf32, #tpu.memory_space<vmem>>) attributes {dimension_semantics = [], scalar_prefetch = 0 : i64, scratch_operands = 0 : i64, tpu.core_type = #tpu.core_type<tc>} {
    %c0 = arith.constant 0 : index
    %c0_0 = arith.constant 0 : index
    %0 = vector.load %arg0[%c0, %c0_0] : memref<8x128xf32, #tpu.memory_space<vmem>>, vector<8x128xf32>
    %c1_i32 = arith.constant 1 : i32
    %1 = tpu.dynamic_rotate %0 by %c1_i32 dim 1 : vector<8x128xf32>, i32 -> vector<8x128xf32>
    %c0_1 = arith.constant 0 : index
    %c0_2 = arith.constant 0 : index
    %2 = vector.load %arg1[%c0_1, %c0_2] : memref<8x128xf32, #tpu.memory_space<vmem>>, vector<8x128xf32>
    tpu.vector_store %arg1[%c0_1, %c0_2], %1 {strides = array<i32>} : memref<8x128xf32, #tpu.memory_space<vmem>>, vector<8x128xf32>,
    return
  }
}

</mosaic_0001>

<bundles_post_ra>
// kernel: tpu_custom_call.1
= control target key start
LH: loop header
LB: loop body
LE: loop exit
PB: predicated region body
PF: predicated region fallthrough
CT: control target
= control target key end

     0   :  { %6 = vsyncpa [#allocation3], 0  ;;  %s128_s0 = inlined_call_operand.hbm [shape: f32[8,128], index: 0, kind: input, shape index: {}]   ;;  %s129_s1 = inlined_call_operand.hbm [shape: f32[8,128], index: 1, kind: output, shape index: {}]  }
   0x1   :  { %7 = vsyncpa [#allocation4], 0  ;;  %s91_s6 = smov [#allocation2]   ;;  %s43_s10 = scalar_lea.hbm %s128_s0, 128 }
   0x2   :  { %s14_s7 = sshll.u32 %s91_s6, 4  ;;  %p44_p0 = scmp.ne.s32.totalorder %s128_s0, %s43_s10  ;;  %s15_s7 = int_to_ptr.vmem [resolvable:$true] %s14_s7 }
   0x3   :  { %p47_p1 = scmp.lt.u32.totalorder %s43_s10, %s128_s0 }
   0x5   :  { %p49_p2 = pnand %p47_p1, %p44_p0 }
   0x7   :  { %52 = shalt.err (!%p49_p2)
}
   0x8   :  { %s53_s15 = scalar_lea.vmem %s15_s7, 128  ;;  %p58_p4 = scmp.lt.s32.totalorder %s15_s7, %s15_s7 }
   0x9   :  { %p54_p3 = scmp.ne.s32.totalorder %s15_s7, %s53_s15  ;;  %p59_p5 = scmp.lt.s32.totalorder %s53_s15, %s53_s15 }
   0xb   :  { %p60_p6 = por %p59_p5, %p58_p4 }
   0xd   :  { %p61_p7 = pnand %p60_p6, %p54_p3 }
   0xf   :  { %64 = shalt.err (!%p61_p7)
}
  0x10   :  { %17 = dma.hbm_to_vmem [thread:$0]  %s128_s0, 128, %s15_s7, [#allocation3]  }
  0x11   :  { %87 = dma.done.wait [#allocation3], 128  }
  0x12   :  { %88 = vsyncadd [#allocation3], 4294967168  ;;  %v21_v0 = vld [vmem:[#allocation2] sm:$0xff]  ;;  %s92_s18 = smov 1   ;;  %s93_s19 = smov [#allocation5]  }
  0x13   :  { %22 = vrot.lane.b32.xlu0 %v21_v0, %s92_s18  ;;  %s31_s20 = sshll.u32 %s93_s19, 4  ;;  %s32_s20 = int_to_ptr.vmem [resolvable:$true] %s31_s20 }
  0x14   :  { %s65_s21 = scalar_lea.vmem %s32_s20, 128  ;;  %p70_p9 = scmp.lt.s32.totalorder %s32_s20, %s32_s20 }
  0x15   :  { %p66_p8 = scmp.ne.s32.totalorder %s32_s20, %s65_s21  ;;  %p71_p10 = scmp.lt.s32.totalorder %s65_s21, %s65_s21 }
  0x17   :  { %p72_p11 = por %p71_p10, %p70_p9 }
  0x19   :  { %p73_p12 = pnand %p72_p11, %p66_p8 }
  0x85   :  { %v23_v1 = vpop.permute.xlu0 %22 }
  0x86   :  { %24 = vst [vmem:[#allocation5] sm:$0xff] %v23_v1 }
  0x87   :  { %76 = shalt.err (!%p73_p12)
}
  0x88   :  { %s77_s0 = scalar_lea.hbm %s129_s1, 128 }
  0x89   :  { %p78_p13 = scmp.ne.s32.totalorder %s129_s1, %s77_s0  ;;  %p81_p0 = scmp.lt.u32.totalorder %s77_s0, %s129_s1 }
  0x8b   :  { %p83_p1 = pnand %p81_p0, %p78_p13 }
  0x8d   :  { %86 = shalt.err (!%p83_p1)
}
  0x8e   :  { %34 = dma.vmem_to_hbm [thread:$0]  %s32_s20, 128, %s129_s1, [#allocation4]  }
  0x8f   :  { %89 = dma.done.wait [#allocation4], 128  }
  0x90   :  { %90 = vsyncadd [#allocation4], 4294967168 }
  0x91   :  { %38 = vsyncpa [#allocation3], 1 }
  0x92   :  { %39 = vsyncpa [#allocation4], 1 }

</bundles_post_ra>
